<compile_context>
chip_gen: v7x
topology: tpu7x:2x2x1
jax: 0.10.0
libtpu: 0.0.40
codegen_flags: <defaults>
</compile_context>

<pallas_src>
import functools

import jax
import jax.numpy as jnp
from jax import lax
from jax.experimental import pallas as pl
from jax.experimental.pallas import tpu as pltpu


# ---------------------------------------------------------------------------
# Moving-average / series-decomposition Pallas kernels
# ---------------------------------------------------------------------------

def _windowed_mean(x_ref, *, kernel_size, pad):
    """Edge-replicated windowed mean over the time axis of one (BB, L, Ct) block.

    Equivalent to: replicate the first/last time step `pad` times on each side,
    then AvgPool1d(kernel_size, stride=1).  Returns (x_f32, mean_f32) where
    mean has shape (BB, L + 2*pad - kernel_size + 1, Ct).
    """
    x = x_ref[...].astype(jnp.float32)
    bb, length, ct = x.shape
    l_out = length + 2 * pad - kernel_size + 1
    hi_off = kernel_size - 1 - pad  # == pad for odd kernel_size

    # Inclusive prefix sum along time (Hillis-Steele: ceil(log2(L)) shifted adds).
    s = x
    shift = 1
    while shift < length:
        s = s + jnp.concatenate(
            [jnp.zeros((bb, shift, ct), jnp.float32), s[:, : length - shift, :]],
            axis=1,
        )
        shift *= 2

    # upper[t] = S[min(t + hi_off, L - 1)]
    n_up = min(l_out, max(length - hi_off, 0))
    parts = []
    if n_up > 0:
        parts.append(s[:, hi_off : hi_off + n_up, :])
    if l_out - n_up > 0:
        parts.append(
            jnp.broadcast_to(s[:, length - 1 : length, :], (bb, l_out - n_up, ct))
        )
    upper = parts[0] if len(parts) == 1 else jnp.concatenate(parts, axis=1)

    # lower[t] = S[t - pad - 1]   (zero for t <= pad)
    n_zero = min(l_out, pad + 1)
    parts = [jnp.zeros((bb, n_zero, ct), jnp.float32)]
    if l_out - n_zero > 0:
        parts.append(s[:, : l_out - n_zero, :])
    lower = parts[0] if len(parts) == 1 else jnp.concatenate(parts, axis=1)

    win = upper - lower  # sum over the in-range (clipped) part of each window

    # Edge-replication corrections: the first `pad` rows re-count x[0] and the
    # last rows re-count x[L-1].  Counts depend only on the output row index.
    if pad > 0 or hi_off > 0:
        t = lax.broadcasted_iota(jnp.int32, (1, l_out, 1), 1)
        n_front = jnp.maximum(pad - t, 0).astype(jnp.float32)
        n_end = jnp.maximum(t + hi_off - (length - 1), 0).astype(jnp.float32)
        win = win + n_front * x[:, 0:1, :] + n_end * x[:, length - 1 : length, :]

    return x, win * (1.0 / kernel_size)


def _moving_avg_kernel(x_ref, mean_ref, *, kernel_size, pad):
    _, mean = _windowed_mean(x_ref, kernel_size=kernel_size, pad=pad)
    mean_ref[...] = mean.astype(mean_ref.dtype)


def _series_decomp_kernel(x_ref, res_ref, mean_ref, *, kernel_size, pad):
    x, mean = _windowed_mean(x_ref, kernel_size=kernel_size, pad=pad)
    mean_ref[...] = mean.astype(mean_ref.dtype)
    res_ref[...] = (x - mean).astype(res_ref.dtype)


# ---------------------------------------------------------------------------
# Tiling heuristics + pallas_call wrappers
# ---------------------------------------------------------------------------

def _pick_channel_tile(c):
    """Largest 128-multiple tile that divides C; otherwise the full dim."""
    for tile in (512, 384, 256, 128):
        if c % tile == 0:
            return tile
    return c  # small / odd channel count: full dim is the only legal block


def _pick_batch_block(b, length, c_tile, c_blocks, target_bytes=1 << 20):
    """Batch block so one grid step moves ~target_bytes (amortize ~0.35us/step)."""
    per_batch = max(length * c_tile * 4, 1)
    bb = max(1, min(b, target_bytes // per_batch))
    # Keep >= 2 grid steps when possible so megacore (v7x 2 TCs) has a split.
    if bb == b and b > 1 and c_blocks == 1:
        bb = b // 2
    while b % bb != 0:  # use an exact divisor -> no ragged blocks
        bb -= 1
    return max(bb, 1)


def _launch_windowed(x, kernel_size, *, fused_residual):
    b, length, c = x.shape
    pad = (kernel_size - 1) // 2
    l_out = length + 2 * pad - kernel_size + 1
    assert l_out >= 1, "kernel_size too large for this sequence length"

    c_tile = _pick_channel_tile(c)
    c_blocks = c // c_tile
    bb = _pick_batch_block(b, length, c_tile, c_blocks)
    grid = (b // bb, c_blocks)

    in_specs = [pl.BlockSpec((bb, length, c_tile), lambda i, j: (i, 0, j))]
    mean_spec = pl.BlockSpec((bb, l_out, c_tile), lambda i, j: (i, 0, j))
    params = pltpu.CompilerParams(dimension_semantics=("parallel", "parallel"))

    if fused_residual:
        assert l_out == length, (
            "series_decomp requires an odd kernel_size so the moving average "
            "matches the input length (Autoformer default is 25)"
        )
        res_spec = pl.BlockSpec((bb, length, c_tile), lambda i, j: (i, 0, j))
        kernel = functools.partial(
            _series_decomp_kernel, kernel_size=kernel_size, pad=pad
        )
        return pl.pallas_call(
            kernel,
            out_shape=(
                jax.ShapeDtypeStruct((b, length, c), x.dtype),   # residual
                jax.ShapeDtypeStruct((b, l_out, c), x.dtype),    # moving mean
            ),
            grid=grid,
            in_specs=in_specs,
            out_specs=(res_spec, mean_spec),
            compiler_params=params,
        )(x)

    kernel = functools.partial(_moving_avg_kernel, kernel_size=kernel_size, pad=pad)
    return pl.pallas_call(
        kernel,
        out_shape=jax.ShapeDtypeStruct((b, l_out, c), x.dtype),
        grid=grid,
        in_specs=in_specs,
        out_specs=mean_spec,
        compiler_params=params,
    )(x)


def moving_avg(x, kernel_size, stride=1):
    """JAX/Pallas equivalent of the PyTorch `moving_avg` module.  x: (B, L, C)."""
    mean = _launch_windowed(x, kernel_size, fused_residual=False)
    if stride == 1:
        return mean
    # AvgPool1d with stride s keeps every s-th stride-1 window.  EncoderLayer /
    # series_decomp only ever use stride=1; this path is completeness glue.
    b, length, _ = x.shape
    pad = (kernel_size - 1) // 2
    l_out_s = (length + 2 * pad - kernel_size) // stride + 1
    return mean[:, : (l_out_s - 1) * stride + 1 : stride, :]


def series_decomp(x, kernel_size):
    """Fused series decomposition: returns (residual, moving_mean)."""
    res, mean = _launch_windowed(x, kernel_size, fused_residual=True)
    return res, mean


# ---------------------------------------------------------------------------
# EncoderLayer forward (Pallas decomposition + plain-JAX glue)
# ---------------------------------------------------------------------------

def _default_attention(q, k, v, attn_mask=None):
    """Stand-in for the attention module injected into EncoderLayer's constructor
    (Autoformer uses AutoCorrelation, which is not part of this spec): plain
    scaled-dot-product self-attention.
    """
    d = q.shape[-1]
    scores = jnp.einsum("bld,bmd->blm", q, k) * (1.0 / float(d) ** 0.5)
    if attn_mask is not None:
        scores = jnp.where(attn_mask, -1e9, scores)
    attn = jax.nn.softmax(scores.astype(jnp.float32), axis=-1).astype(q.dtype)
    return jnp.einsum("blm,bmd->bld", attn, v), attn


def encoder_layer_forward(x, params, *, kernel_size=25, activation="relu",
                          attention_fn=_default_attention, attn_mask=None):
    """Autoformer EncoderLayer forward (eval mode: dropout == identity).

    params:
      conv1_w: (d_ff, d_model)  == nn.Conv1d(d_model, d_ff, 1, bias=False).weight[..., 0]
      conv2_w: (d_model, d_ff)  == nn.Conv1d(d_ff, d_model, 1, bias=False).weight[..., 0]
    """
    # TODO(synk): nn.Dropout (training-mode randomness) is treated as identity
    # (eval-mode forward); the injected attention module has no definition in
    # this spec, so a scaled-dot-product stand-in is used.
    new_x, _ = attention_fn(x, x, x, attn_mask)
    x = x + new_x
    x, _ = series_decomp(x, kernel_size)                         # Pallas fused decomp
    act = jax.nn.relu if activation == "relu" else jax.nn.gelu
    y = act(jnp.einsum("blc,fc->blf", x, params["conv1_w"]))     # 1x1 conv1
    y = jnp.einsum("blf,cf->blc", y, params["conv2_w"])          # 1x1 conv2
    res, _ = series_decomp(x + y, kernel_size)                   # Pallas fused decomp
    return res


# ---------------------------------------------------------------------------
# Pure-JAX references (mirror the PyTorch forward exactly)
# ---------------------------------------------------------------------------

def _reference_moving_avg(x, kernel_size, stride):
    pad = (kernel_size - 1) // 2
    front = jnp.repeat(x[:, 0:1, :], pad, axis=1)
    end = jnp.repeat(x[:, -1:, :], pad, axis=1)
    xp = jnp.concatenate([front, x, end], axis=1)
    l_pad = xp.shape[1]
    l_out = (l_pad - kernel_size) // stride + 1
    wins = [
        xp[:, t * stride : t * stride + kernel_size, :].mean(axis=1)
        for t in range(l_out)
    ]
    return jnp.stack(wins, axis=1)


def _reference_encoder_layer(x, params, *, kernel_size, activation="relu"):
    new_x, _ = _default_attention(x, x, x, None)
    x = x + new_x
    x = x - _reference_moving_avg(x, kernel_size, 1)
    act = jax.nn.relu if activation == "relu" else jax.nn.gelu
    y = act(jnp.einsum("blc,fc->blf", x, params["conv1_w"]))
    y = jnp.einsum("blf,cf->blc", y, params["conv2_w"])
    xy = x + y
    return xy - _reference_moving_avg(xy, kernel_size, 1)


# ---------------------------------------------------------------------------

if __name__ == "__main__":
    key = jax.random.PRNGKey(0)

    # --- moving_avg kernel checks (odd/even kernels, stride, lane-dense case) --
    cases = [
        (2, 24, 16, 5, 1),    # small, odd kernel, stride 1
        (2, 24, 16, 6, 2),    # even kernel + stride>1 (AvgPool generality)
        (2, 96, 128, 25, 1),  # Autoformer-like: 128-lane channels, default k=25
    ]
    for (B, L, C, ksz, s) in cases:
        key, sub = jax.random.split(key)
        x = jax.random.normal(sub, (B, L, C), dtype=jnp.float32)
        out = jax.block_until_ready(moving_avg(x, ksz, s))
        ref = _reference_moving_avg(x, ksz, s)
        assert out.shape == ref.shape, (out.shape, ref.shape)
        assert jnp.allclose(out, ref, atol=1e-4, rtol=1e-4), (B, L, C, ksz, s)

    # --- fused series_decomp kernel check ---
    key, sub = jax.random.split(key)
    x = jax.random.normal(sub, (2, 96, 128), dtype=jnp.float32)
    res, mean = series_decomp(x, 25)
    res = jax.block_until_ready(res)
    ref_mean = _reference_moving_avg(x, 25, 1)
    assert jnp.allclose(mean, ref_mean, atol=1e-4, rtol=1e-4)
    assert jnp.allclose(res, x - ref_mean, atol=1e-4, rtol=1e-4)

    # --- full EncoderLayer forward (Pallas decomp + JAX glue) ---
    B, L, d_model, d_ff, ksz = 2, 24, 16, 32, 5
    key, kx, k1, k2 = jax.random.split(key, 4)
    x = jax.random.normal(kx, (B, L, d_model), dtype=jnp.float32)
    params = {
        "conv1_w": jax.random.normal(k1, (d_ff, d_model), jnp.float32) * 0.1,
        "conv2_w": jax.random.normal(k2, (d_model, d_ff), jnp.float32) * 0.1,
    }
    out = jax.block_until_ready(encoder_layer_forward(x, params, kernel_size=ksz))
    ref = _reference_encoder_layer(x, params, kernel_size=ksz)
    assert out.shape == ref.shape, (out.shape, ref.shape)
    assert jnp.allclose(out, ref, atol=1e-4, rtol=1e-4), "encoder layer mismatch"

    print("KERNEL_OK")
</pallas_src>

<mosaic_0001>
module attributes {stable_mosaic.version = 11 : i64} {
  func.func @_moving_avg_kernel(%arg0: i32, %arg1: i32, %arg2: memref<1x24x16xf32, #tpu.memory_space<vmem>>, %arg3: memref<1x24x16xf32, #tpu.memory_space<vmem>>) attributes {dimension_semantics = [#tpu.dimension_semantics<parallel>, #tpu.dimension_semantics<parallel>], iteration_bounds = array<i64: 2, 1>, scalar_prefetch = 0 : i64, scratch_operands = 0 : i64, tpu.core_type = #tpu.core_type<tc>, window_params = [{transform_indices = @transform_0, window_bounds = array<i64: 1, 24, 16>}, {transform_indices = @transform_1, window_bounds = array<i64: 1, 24, 16>}]} {
    %c0 = arith.constant 0 : index
    %c0_0 = arith.constant 0 : index
    %c0_1 = arith.constant 0 : index
    %0 = vector.load %arg2[%c0, %c0_0, %c0_1] : memref<1x24x16xf32, #tpu.memory_space<vmem>>, vector<1x24x16xf32>
    %cst = arith.constant 0.000000e+00 : f32
    %1 = vector.broadcast %cst : f32 to vector<1x1x16xf32>
    %2 = vector.extract_strided_slice %0 {offsets = [0, 0, 0], sizes = [1, 23, 16], strides = [1, 1, 1]} : vector<1x24x16xf32> to vector<1x23x16xf32>
    %3 = tpu.concatenate %1, %2 in 1 : vector<1x1x16xf32>, vector<1x23x16xf32> -> vector<1x24x16xf32>
    %4 = arith.addf %0, %3 : vector<1x24x16xf32>
    %cst_2 = arith.constant 0.000000e+00 : f32
    %5 = vector.broadcast %cst_2 : f32 to vector<1x2x16xf32>
    %6 = vector.extract_strided_slice %4 {offsets = [0, 0, 0], sizes = [1, 22, 16], strides = [1, 1, 1]} : vector<1x24x16xf32> to vector<1x22x16xf32>
    %7 = tpu.concatenate %5, %6 in 1 : vector<1x2x16xf32>, vector<1x22x16xf32> -> vector<1x24x16xf32>
    %8 = arith.addf %4, %7 : vector<1x24x16xf32>
    %cst_3 = arith.constant 0.000000e+00 : f32
    %9 = vector.broadcast %cst_3 : f32 to vector<1x4x16xf32>
    %10 = vector.extract_strided_slice %8 {offsets = [0, 0, 0], sizes = [1, 20, 16], strides = [1, 1, 1]} : vector<1x24x16xf32> to vector<1x20x16xf32>
    %11 = tpu.concatenate %9, %10 in 1 : vector<1x4x16xf32>, vector<1x20x16xf32> -> vector<1x24x16xf32>
    %12 = arith.addf %8, %11 : vector<1x24x16xf32>
    %cst_4 = arith.constant 0.000000e+00 : f32
    %13 = vector.broadcast %cst_4 : f32 to vector<1x8x16xf32>
    %14 = vector.extract_strided_slice %12 {offsets = [0, 0, 0], sizes = [1, 16, 16], strides = [1, 1, 1]} : vector<1x24x16xf32> to vector<1x16x16xf32>
    %15 = tpu.concatenate %13, %14 in 1 : vector<1x8x16xf32>, vector<1x16x16xf32> -> vector<1x24x16xf32>
    %16 = arith.addf %12, %15 : vector<1x24x16xf32>
    %cst_5 = arith.constant 0.000000e+00 : f32
    %17 = vector.broadcast %cst_5 : f32 to vector<1x16x16xf32>
    %18 = vector.extract_strided_slice %16 {offsets = [0, 0, 0], sizes = [1, 8, 16], strides = [1, 1, 1]} : vector<1x24x16xf32> to vector<1x8x16xf32>
    %19 = tpu.concatenate %17, %18 in 1 : vector<1x16x16xf32>, vector<1x8x16xf32> -> vector<1x24x16xf32>
    %20 = arith.addf %16, %19 : vector<1x24x16xf32>
    %21 = vector.extract_strided_slice %20 {offsets = [0, 2, 0], sizes = [1, 22, 16], strides = [1, 1, 1]} : vector<1x24x16xf32> to vector<1x22x16xf32>
    %22 = vector.extract_strided_slice %20 {offsets = [0, 23, 0], sizes = [1, 1, 16], strides = [1, 1, 1]} : vector<1x24x16xf32> to vector<1x1x16xf32>
    %23 = vector.shape_cast %22 : vector<1x1x16xf32> to vector<1x1x16xf32>
    %24 = vector.broadcast %23 : vector<1x1x16xf32> to vector<1x2x16xf32>
    %25 = tpu.concatenate %21, %24 in 1 : vector<1x22x16xf32>, vector<1x2x16xf32> -> vector<1x24x16xf32>
    %cst_6 = arith.constant 0.000000e+00 : f32
    %26 = vector.broadcast %cst_6 : f32 to vector<1x3x16xf32>
    %27 = vector.extract_strided_slice %20 {offsets = [0, 0, 0], sizes = [1, 21, 16], strides = [1, 1, 1]} : vector<1x24x16xf32> to vector<1x21x16xf32>
    %28 = tpu.concatenate %26, %27 in 1 : vector<1x3x16xf32>, vector<1x21x16xf32> -> vector<1x24x16xf32>
    %29 = arith.subf %25, %28 : vector<1x24x16xf32>
    %30 = tpu.iota {dimensions = array<i32: 1>} : vector<1x24x1xi32>
    %c2_i32 = arith.constant 2 : i32
    %31 = vector.broadcast %c2_i32 : i32 to vector<1x24x1xi32>
    %32 = arith.subi %31, %30 : vector<1x24x1xi32>
    %c0_i32 = arith.constant 0 : i32
    %33 = vector.broadcast %c0_i32 : i32 to vector<1x24x1xi32>
    %34 = arith.maxsi %32, %33 : vector<1x24x1xi32>
    %35 = arith.sitofp %34 : vector<1x24x1xi32> to vector<1x24x1xf32>
    %c2_i32_7 = arith.constant 2 : i32
    %36 = vector.broadcast %c2_i32_7 : i32 to vector<1x24x1xi32>
    %37 = arith.addi %30, %36 : vector<1x24x1xi32>
    %c23_i32 = arith.constant 23 : i32
    %38 = vector.broadcast %c23_i32 : i32 to vector<1x24x1xi32>
    %39 = arith.subi %37, %38 : vector<1x24x1xi32>
    %c0_i32_8 = arith.constant 0 : i32
    %40 = vector.broadcast %c0_i32_8 : i32 to vector<1x24x1xi32>
    %41 = arith.maxsi %39, %40 : vector<1x24x1xi32>
    %42 = arith.sitofp %41 : vector<1x24x1xi32> to vector<1x24x1xf32>
    %43 = vector.extract_strided_slice %0 {offsets = [0, 0, 0], sizes = [1, 1, 16], strides = [1, 1, 1]} : vector<1x24x16xf32> to vector<1x1x16xf32>
    %44 = vector.broadcast %35 : vector<1x24x1xf32> to vector<1x24x16xf32>
    %45 = vector.broadcast %43 : vector<1x1x16xf32> to vector<1x24x16xf32>
    %46 = arith.mulf %44, %45 : vector<1x24x16xf32>
    %47 = arith.addf %29, %46 : vector<1x24x16xf32>
    %48 = vector.extract_strided_slice %0 {offsets = [0, 23, 0], sizes = [1, 1, 16], strides = [1, 1, 1]} : vector<1x24x16xf32> to vector<1x1x16xf32>
    %49 = vector.broadcast %42 : vector<1x24x1xf32> to vector<1x24x16xf32>
    %50 = vector.broadcast %48 : vector<1x1x16xf32> to vector<1x24x16xf32>
    %51 = arith.mulf %49, %50 : vector<1x24x16xf32>
    %52 = arith.addf %47, %51 : vector<1x24x16xf32>
    %cst_9 = arith.constant 2.000000e-01 : f32
    %53 = vector.broadcast %cst_9 : f32 to vector<1x24x16xf32>
    %54 = arith.mulf %52, %53 : vector<1x24x16xf32>
    %c0_10 = arith.constant 0 : index
    %c0_11 = arith.constant 0 : index
    %c0_12 = arith.constant 0 : index
    %55 = vector.load %arg3[%c0_10, %c0_11, %c0_12] : memref<1x24x16xf32, #tpu.memory_space<vmem>>, vector<1x24x16xf32>
    tpu.vector_store %arg3[%c0_10, %c0_11, %c0_12], %54 {strides = array<i32>} : memref<1x24x16xf32, #tpu.memory_space<vmem>>, vector<1x24x16xf32>,
    return
  }
  func.func @transform_0(%arg0: i32, %arg1: i32) -> (i32, i32, i32) {
    %c0_i32 = arith.constant 0 : i32
    %c0_i32_0 = arith.constant 0 : i32
    return %arg0, %c0_i32, %arg1 : i32, i32, i32
  }
  func.func @transform_1(%arg0: i32, %arg1: i32) -> (i32, i32, i32) {
    %c0_i32 = arith.constant 0 : i32
    %c0_i32_0 = arith.constant 0 : i32
    return %arg0, %c0_i32, %arg1 : i32, i32, i32
  }
}

</mosaic_0001>

<bundles_post_ra>
// kernel: tpu_custom_call.1
= control target key start
LH: loop header
LB: loop body
LE: loop exit
PB: predicated region body
PF: predicated region fallthrough
CT: control target
= control target key end

     0   :  { %s451_s6 = smov 0   ;;  %s453_s7 = smov 0   ;;  %s503_s0 = inlined_call_operand.vmem [shape: f32[2,24,16], index: 0, kind: input, shape index: {}]   ;;  %s504_s1 = inlined_call_operand.vmem [shape: f32[2,24,16], index: 1, kind: output, shape index: {}]  }
   0x1   :  { %s455_s8 = smov 0  }
   0x2 LB: > { %s23_s9 = sadd.s32 1, %s435_s7  ;;  %p380_p0 = scmp.ge.s32.totalorder %s439_s8, 1  ;;  %s439_s8 = sphi %s455_s8, %s11_s8   ;;  %s435_s7 = sphi %s453_s7, %s508_s7   ;;  %s431_s6 = sphi %s451_s6, %s507_s6  }
   0x3   : > { %p25_p1 = scmp.ge.s32.totalorder %s23_s9, 2  ;;  %p106_p2 = scmp.lt.s32.totalorder %s439_s8, 3 }
   0x5   : > { %s510_s9 = smov (%p25_p1, %s23_s9), 0  ;;  %p107_p3 = pnand %p380_p0, %p106_p2 }
   0x6   : > { %p132_p4 = scmp.lt.s32.totalorder (!%p107_p3), %s431_s6, 1  ;;  %v205_v0 = vlaneseq (!%p107_p3)  ;;  %vm154_vm0 = vcmask (!%p107_p3), 1040384   ;;  %vm170_vm1 = vcmask (!%p107_p3), 1041408   ;;  %vm186_vm2 = vcmask (!%p107_p3), 1043456  }
   0x7   : > { %110 = sbr.rel (%p107_p3) target bundleno = 51 (0x33), region = 24  ;;  %vm222_vm4 = vcmask (!%p107_p3), 1042432   ;;  %vm212_vm5 = vcmask (!%p107_p3), 1045504   ;;  %vm289_vm7 = vcmask (!%p107_p3), 130048  }
   0x8   : > { %v206_v7 = vshrl.u32 (!%p107_p3), %v205_v0, 7 }
   0xa   : > { %v238_v14 = vadd.s32 (!%p107_p3), 16, %v206_v7  ;;  %v239_v18 = vsub.s32 (!%p107_p3), 2, %v206_v7  ;;  %v268_v26 = vsub.s32 (!%p107_p3), 0, %v206_v7  ;;  %v207_v31 = vsub.s32 (!%p107_p3), 7, %v206_v7 }
   0xc   : > { %v253_v25 = vadd.s32 (!%p107_p3), 2, %v238_v14  ;;  %v383_v30 = vcvt.s32.f32 (!%p107_p3), %v239_v18  ;;  %vm477_vm3 = vcmp.gt.s32.totalorder (!%p107_p3), %v239_v18, 0 }
   0xe   : > { %s512_s6 = smov (!%p132_p4, %s431_s6), 1  ;;  %v387_v36 = vadd.s32 4294967273, %v253_v25  ;;  %v384_v40 = vsel %vm477_vm3, %v383_v30, 0.0 }
   0xf   : > { %s392_s10 = smul.u32 24, %s512_s6 }
  0x10   : > { %vm261_vm6 = vcmp.gt.s32.totalorder %v387_v36, 0  ;;  %v388_v47 = vcvt.s32.f32 %v387_v36 }
  0x11   : > { %s139_s13 = scalar_lea.vmem %s503_s0, %s392_s10  ;;  %s147_s16 = scalar_lea.vmem %s504_s1, %s392_s10 }
  0x12   : > { %v148_v1 = vld [vmem:[%s139_s13] sm:$0xff]  ;;  %v149_v2 = vld [vmem:[%s139_s13 + $0x8] sm:$0xff]  ;;  %v150_v3 = vld [vmem:[%s139_s13 + $0x10] sm:$0xff]  ;;  %v389_v61 = vsel %vm261_vm6, %v388_v47, 0.0 }
  0x13   : > { %v155_v4 = vrot.slane %v148_v1, 7  ;;  %v156_v5 = vrot.slane %v149_v2, 7  ;;  %v158_v6 = vrot.slane %v150_v3, 7  ;;  %v269_v41 = vrot.slane %v148_v1, %v268_v26 }
  0x14   : > { %v279_v42 = vrot.slane %v150_v3, %v207_v31 }
  0x15   : > { %v157_v8 = vsel %vm154_vm0, %v155_v4, %v156_v5  ;;  %v159_v9 = vsel %vm154_vm0, %v156_v5, %v158_v6  ;;  %v163_v10 = vsel %vm154_vm0, 0.0, %v155_v4  ;;  %v270_v52 = vmul.f32 %v384_v40, %v269_v41 }
  0x16   : > { %v164_v11 = vadd.f32 %v163_v10, %v148_v1  ;;  %v165_v12 = vadd.f32 %v157_v8, %v149_v2  ;;  %v166_v13 = vadd.f32 %v159_v9, %v150_v3  ;;  %v280_v53 = vmul.f32 0.0, %v279_v42 }
  0x17   : > { %v271_v59 = vmul.f32 0.0, %v269_v41  ;;  %v282_v4 = vmul.f32 %v389_v61, %v279_v42 }
  0x18   : > { %v171_v15 = vrot.slane %v164_v11, 6  ;;  %v172_v16 = vrot.slane %v165_v12, 6  ;;  %v174_v17 = vrot.slane %v166_v13, 6 }
  0x1a   : > { %v173_v19 = vsel %vm170_vm1, %v171_v15, %v172_v16  ;;  %v175_v20 = vsel %vm170_vm1, %v172_v16, %v174_v17  ;;  %v179_v21 = vsel %vm170_vm1, 0.0, %v171_v15 }
  0x1b   : > { %v180_v22 = vadd.f32 %v179_v21, %v164_v11  ;;  %v181_v23 = vadd.f32 %v173_v19, %v165_v12  ;;  %v182_v24 = vadd.f32 %v175_v20, %v166_v13 }
  0x1d   : > { %v187_v27 = vrot.slane %v180_v22, 4  ;;  %v188_v28 = vrot.slane %v181_v23, 4  ;;  %v190_v29 = vrot.slane %v182_v24, 4 }
  0x1f   : > { %v189_v33 = vsel %vm186_vm2, %v187_v27, %v188_v28  ;;  %v191_v34 = vsel %vm186_vm2, %v188_v28, %v190_v29  ;;  %v195_v35 = vsel %vm186_vm2, 0.0, %v187_v27 }
  0x20   : > { %v196_v37 = vadd.f32 %v195_v35, %v180_v22  ;;  %v197_v38 = vadd.f32 %v189_v33, %v181_v23  ;;  %v198_v39 = vadd.f32 %v191_v34, %v182_v24 }
  0x22   : > { %v200_v43 = vadd.f32 %v197_v38, %v196_v37  ;;  %v201_v44 = vadd.f32 %v198_v39, %v197_v38  ;;  %v213_v45 = vrot.slane %v196_v37, 2  ;;  %v223_v46 = vrot.slane %v196_v37, 5 }
  0x24   : > { %v204_v48 = vadd.f32 %v201_v44, %v196_v37  ;;  %v214_v49 = vrot.slane %v200_v43, 2  ;;  %v231_v50 = vsel %vm222_vm4, 0.0, %v223_v46  ;;  %v224_v51 = vrot.slane %v200_v43, 5 }
  0x26   : > { %v208_v54 = vrot.slane %v204_v48, %v207_v31  ;;  %v215_v55 = vsel %vm212_vm5, %v213_v45, %v214_v49  ;;  %v216_v56 = vrot.slane %v204_v48, 2  ;;  %v225_v57 = vsel %vm222_vm4, %v223_v46, %v224_v51 }
  0x27   : > { %v232_v58 = vsub.f32 %v215_v55, %v231_v50  ;;  %v226_v60 = vrot.slane %v204_v48, 5 }
  0x28   : > { %v217_v62 = vsel %vm212_vm5, %v214_v49, %v216_v56  ;;  %v221_v63 = vsel %vm212_vm5, %v216_v56, %v208_v54 }
  0x29   : > { %v273_v0 = vadd.f32 %v270_v52, %v232_v58  ;;  %v233_v1 = vsub.f32 %v217_v62, %v225_v57  ;;  %v227_v2 = vsel %vm222_vm4, %v224_v51, %v226_v60 }
  0x2a   : > { %v234_v3 = vsub.f32 %v221_v63, %v227_v2 }
  0x2b   : > { %v283_v5 = vadd.f32 %v280_v53, %v273_v0  ;;  %v274_v6 = vadd.f32 %v271_v59, %v233_v1 }
  0x2c   : > { %v275_v7 = vadd.f32 %v271_v59, %v234_v3 }
  0x2d   : > { %v286_v8 = vmul.f32 0.2, %v283_v5  ;;  %v284_v9 = vadd.f32 %v280_v53, %v274_v6 }
  0x2e   : > { %v285_v10 = vadd.f32 %v282_v4, %v275_v7 }
  0x2f   : > { %290 = vst.msk [vmem:[%s147_s16] sm:$0xff] %vm289_vm7, %v286_v8  ;;  %v287_v11 = vmul.f32 0.2, %v284_v9 }
  0x30   : > { %v288_v12 = vmul.f32 0.2, %v285_v10 }
  0x31   : > { %291 = vst.msk [vmem:[%s147_s16 + $0x8] sm:$0xff] %vm289_vm7, %v287_v11 }
  0x32   : > { %292 = vst.msk [vmem:[%s147_s16 + $0x10] sm:$0xff] %vm289_vm7, %v288_v12 }
  0x33 PF: > { %s11_s8 = sadd.s32 1, %s439_s8   ;;  %s507_s6 = smov %s435_s7 }
  0x34   : > { %p8_p5 = scmp.ge.s32.totalorder %s11_s8, 4   ;;  %s508_s7 = smov %s510_s9 }
  0x36   :  { %10 = sbr.rel (!%p8_p5) target bundleno = 2 (0x2), region = 54 }

</bundles_post_ra>
